<compile_context>
chip_gen: v5e
topology: v5e:2x2
jax: 0.10.0
libtpu: 0.0.40
codegen_flags: <defaults>
</compile_context>

<pallas_src>
import functools

import jax
import jax.numpy as jnp
import numpy as np
from jax.experimental import pallas as pl
from jax.experimental.pallas import tpu as pltpu


def _grouped_ffn_kernel(block_expert_ref, x_ref, w13_ref, w2_ref, o_ref,
                        acc_ref, *, tile_h):
    """One grid step: (block_m tokens of one expert) x (one hidden tile).

    block_expert_ref: (num_blocks,) int32 in SMEM (scalar prefetch; consumed by
                      the index_maps, unused in the body).
    x_ref:   (block_m, D)      activation rows for this token block.
    w13_ref: (1, 2*tile_h, D)  fused [w1_tile; w3_tile] for this expert / tile.
    w2_ref:  (1, tile_h, D)    w2 tile for this expert / tile.
    o_ref:   (block_m, D)      output rows for this token block.
    acc_ref: (block_m, D) f32  VMEM accumulator across hidden tiles.
    """
    h_idx = pl.program_id(1)

    @pl.when(h_idx == 0)
    def _init():
        acc_ref[...] = jnp.zeros_like(acc_ref)

    w13 = w13_ref[0]                      # (2*tile_h, D)
    w2t = w2_ref[0]                       # (tile_h, D)
    x = x_ref[...].astype(w13.dtype)      # (block_m, D), bf16 on the MXU path

    # Fused gate/up projection: contract D (last dim of both operands).
    h = jax.lax.dot_general(
        x, w13, (((1,), (1,)), ((), ())),
        preferred_element_type=jnp.float32)          # (block_m, 2*tile_h)
    h1 = h[:, :tile_h]
    h3 = h[:, tile_h:]
    gated = (h1 * jax.nn.sigmoid(h1)) * h3           # silu(h1) * h3, f32

    # Down projection for this hidden tile; accumulate over hidden tiles.
    acc_ref[...] += jnp.dot(gated.astype(w2t.dtype), w2t,
                            preferred_element_type=jnp.float32)

    @pl.when(h_idx == pl.num_programs(1) - 1)
    def _finalize():
        o_ref[...] = acc_ref[...].astype(o_ref.dtype)


@functools.partial(jax.jit,
                   static_argnames=("block_m", "tile_h", "weight_dtype"))
def conditional_feed_forward(x, expert_indices, w1, w2, w3, *,
                             block_m=8, tile_h=None,
                             weight_dtype=jnp.bfloat16):
    """x: (T, D), expert_indices: (T, A) int32, w*: (E, H, D) -> (T, A, D)."""
    T, D = x.shape
    E, H, D_w = w1.shape
    assert D_w == D
    A = expert_indices.shape[1]
    S = T * A

    if tile_h is None:
        tile_h = H
    assert H % tile_h == 0 and tile_h % 8 == 0
    assert block_m % 8 == 0
    num_h = H // tile_h

    # ---------------- routing bookkeeping (static shapes, plain XLA) --------
    idx_flat = expert_indices.reshape(-1).astype(jnp.int32)            # (S,)
    sort_order = jnp.argsort(idx_flat).astype(jnp.int32)               # slots grouped by expert
    sorted_experts = idx_flat[sort_order]                              # (S,)

    counts = jnp.bincount(idx_flat, length=E).astype(jnp.int32)        # (E,)
    blocks_per_e = (counts + block_m - 1) // block_m                   # (E,)
    block_start_e = jnp.concatenate(
        [jnp.zeros((1,), jnp.int32), jnp.cumsum(blocks_per_e)[:-1]]).astype(jnp.int32)
    group_start_e = jnp.concatenate(
        [jnp.zeros((1,), jnp.int32), jnp.cumsum(counts)[:-1]]).astype(jnp.int32)

    # Static upper bound on the number of expert blocks (ragged-group padding).
    num_blocks = (S + block_m - 1) // block_m + E
    S_pad = num_blocks * block_m

    rank = jnp.arange(S, dtype=jnp.int32) - group_start_e[sorted_experts]
    padded_row = block_start_e[sorted_experts] * block_m + rank        # (S,)

    # row -> original flat slot (padding rows point at slot 0; output ignored)
    row_to_slot = jnp.zeros((S_pad,), jnp.int32).at[padded_row].set(sort_order)
    # original flat slot -> row (to un-permute the kernel output)
    slot_to_row = jnp.zeros((S,), jnp.int32).at[sort_order].set(padded_row)
    # expert used by each block (unused trailing blocks get the last expert; harmless)
    block_expert = jnp.searchsorted(
        block_start_e, jnp.arange(num_blocks, dtype=jnp.int32),
        side="right").astype(jnp.int32) - 1

    # Gather activations into expert-grouped, block-padded row order.
    x_grouped = jnp.take(x, row_to_slot // A, axis=0)                  # (S_pad, D)

    # ---------------- weight packing ----------------------------------------
    # Fuse w1/w3 tile-interleaved so one (1, 2*tile_h, D) DMA per step feeds a
    # single (M, D) x (D, 2*tile_h) matmul whose first/second column halves are
    # the gate/up projections of the same hidden tile.
    w13 = jnp.concatenate(
        [w1.reshape(E, num_h, tile_h, D), w3.reshape(E, num_h, tile_h, D)],
        axis=2).reshape(E, 2 * H, D).astype(weight_dtype)
    w2q = w2.astype(weight_dtype)

    kernel = functools.partial(_grouped_ffn_kernel, tile_h=tile_h)

    grid_spec = pltpu.PrefetchScalarGridSpec(
        num_scalar_prefetch=1,
        grid=(num_blocks, num_h),
        in_specs=[
            # activations: one (block_m, D) row block per token block
            pl.BlockSpec((block_m, D), lambda b, h, be: (b, 0)),
            # fused w1/w3 tile, gathered by the per-block expert id
            pl.BlockSpec((1, 2 * tile_h, D), lambda b, h, be: (be[b], h, 0)),
            # w2 tile for the same expert / hidden tile
            pl.BlockSpec((1, tile_h, D), lambda b, h, be: (be[b], h, 0)),
        ],
        out_specs=pl.BlockSpec((block_m, D), lambda b, h, be: (b, 0)),
        scratch_shapes=[pltpu.VMEM((block_m, D), jnp.float32)],
    )

    out_grouped = pl.pallas_call(
        kernel,
        out_shape=jax.ShapeDtypeStruct((S_pad, D), x.dtype),
        grid_spec=grid_spec,
        compiler_params=pltpu.CompilerParams(
            dimension_semantics=("parallel", "arbitrary")),
    )(block_expert, x_grouped, w13, w2q)

    # Un-permute back to (T, A, D) slot order.
    out_flat = jnp.take(out_grouped, slot_to_row, axis=0)              # (S, D)
    return out_flat.reshape(T, A, D)


def conditional_feed_forward_ref(x, expert_indices, w1, w2, w3,
                                 weight_dtype=jnp.float32):
    """Pure-JAX reference mirroring the PyTorch forward.  For
    weight_dtype != float32 it also mirrors the kernel's cast points so the
    comparison isolates kernel bugs from the (intentional) quantization."""
    xq = x.astype(weight_dtype)
    w1g = w1.astype(weight_dtype)[expert_indices]   # (T, A, H, D)
    w3g = w3.astype(weight_dtype)[expert_indices]
    w2g = w2.astype(weight_dtype)[expert_indices]
    h1 = jnp.einsum('ti,taoi->tao', xq, w1g, preferred_element_type=jnp.float32)
    h3 = jnp.einsum('ti,taoi->tao', xq, w3g, preferred_element_type=jnp.float32)
    gated = (jax.nn.silu(h1) * h3).astype(weight_dtype)
    return jnp.einsum('tao,taoi->tai', gated, w2g,
                      preferred_element_type=jnp.float32)


if __name__ == "__main__":
    # Config (synthetic, deterministic): dim=32, multiple_of=32, num_experts=4
    dim = 32
    multiple_of = 32
    num_experts = 4
    hidden_dim = 4 * dim
    hidden_dim = int(2 * hidden_dim / 3)
    hidden_dim = multiple_of * ((hidden_dim + multiple_of - 1) // multiple_of)  # 96

    T = 8      # tokens
    A = 2      # experts per token (top-2 routing)

    key = jax.random.PRNGKey(0)
    k1, k2, k3, kx, ki = jax.random.split(key, 5)
    w1 = jax.random.normal(k1, (num_experts, hidden_dim, dim), dtype=jnp.float32)
    w2 = jax.random.normal(k2, (num_experts, hidden_dim, dim), dtype=jnp.float32)
    w3 = jax.random.normal(k3, (num_experts, hidden_dim, dim), dtype=jnp.float32)
    x = jax.random.normal(kx, (T, dim), dtype=jnp.float32)
    expert_indices = jax.random.randint(ki, (T, A), 0, num_experts, dtype=jnp.int32)

    # --- f32 weight path: exact semantics of the original module -------------
    out_f32 = jax.block_until_ready(conditional_feed_forward(
        x, expert_indices, w1, w2, w3,
        block_m=8, tile_h=48, weight_dtype=jnp.float32))
    ref_f32 = conditional_feed_forward_ref(x, expert_indices, w1, w2, w3,
                                           weight_dtype=jnp.float32)
    np.testing.assert_allclose(np.asarray(out_f32), np.asarray(ref_f32),
                               rtol=2e-4, atol=2e-3)

    # --- bf16 weight path (production setting per perf review) ---------------
    out_bf16 = jax.block_until_ready(conditional_feed_forward(
        x, expert_indices, w1, w2, w3,
        block_m=8, tile_h=48, weight_dtype=jnp.bfloat16))
    ref_bf16 = conditional_feed_forward_ref(x, expert_indices, w1, w2, w3,
                                            weight_dtype=jnp.bfloat16)
    np.testing.assert_allclose(np.asarray(out_bf16), np.asarray(ref_bf16),
                               rtol=2e-2, atol=1.0)

    print("KERNEL_OK")
</pallas_src>

<mosaic_0001>
module attributes {stable_mosaic.version = 11 : i64} {
  func.func @_grouped_ffn_kernel(%arg0: i32, %arg1: i32, %arg2: memref<6xi32, #tpu.memory_space<smem>>, %arg3: memref<8x32xf32, #tpu.memory_space<vmem>>, %arg4: memref<1x96x32xf32, #tpu.memory_space<vmem>>, %arg5: memref<1x48x32xf32, #tpu.memory_space<vmem>>, %arg6: memref<8x32xf32, #tpu.memory_space<vmem>>, %arg7: memref<8x32xf32, #tpu.memory_space<vmem>>) attributes {dimension_semantics = [#tpu.dimension_semantics<parallel>, #tpu.dimension_semantics<arbitrary>], iteration_bounds = array<i64: 6, 2>, scalar_prefetch = 1 : i64, scratch_operands = 1 : i64, tpu.core_type = #tpu.core_type<tc>, window_params = [{transform_indices = @transform_0, window_bounds = array<i64: 8, 32>}, {transform_indices = @transform_1, window_bounds = array<i64: 1, 96, 32>}, {transform_indices = @transform_2, window_bounds = array<i64: 1, 48, 32>}, {transform_indices = @transform_3, window_bounds = array<i64: 8, 32>}]} {
    %c0_i32 = arith.constant 0 : i32
    %0 = arith.cmpi eq, %arg1, %c0_i32 : i32
    %1 = arith.extui %0 : i1 to i32
    %c0_i32_0 = arith.constant 0 : i32
    %2 = arith.cmpi ne, %1, %c0_i32_0 : i32
    scf.if %2 {
      %cst_15 = arith.constant 0.000000e+00 : f32
      %25 = vector.broadcast %cst_15 : f32 to vector<8x32xf32>
      %c0_16 = arith.constant 0 : index
      %c0_17 = arith.constant 0 : index
      %26 = vector.load %arg7[%c0_16, %c0_17] : memref<8x32xf32, #tpu.memory_space<vmem>>, vector<8x32xf32>
      tpu.vector_store %arg7[%c0_16, %c0_17], %25 {strides = array<i32>} : memref<8x32xf32, #tpu.memory_space<vmem>>, vector<8x32xf32>,
    } else {
    }
    %c0 = arith.constant 0 : index
    %c0_1 = arith.constant 0 : index
    %c0_2 = arith.constant 0 : index
    %3 = vector.load %arg4[%c0, %c0_1, %c0_2] : memref<1x96x32xf32, #tpu.memory_space<vmem>>, vector<1x96x32xf32>
    %4 = vector.shape_cast %3 : vector<1x96x32xf32> to vector<96x32xf32>
    %c0_3 = arith.constant 0 : index
    %c0_4 = arith.constant 0 : index
    %c0_5 = arith.constant 0 : index
    %5 = vector.load %arg5[%c0_3, %c0_4, %c0_5] : memref<1x48x32xf32, #tpu.memory_space<vmem>>, vector<1x48x32xf32>
    %6 = vector.shape_cast %5 : vector<1x48x32xf32> to vector<48x32xf32>
    %c0_6 = arith.constant 0 : index
    %c0_7 = arith.constant 0 : index
    %7 = vector.load %arg3[%c0_6, %c0_7] : memref<8x32xf32, #tpu.memory_space<vmem>>, vector<8x32xf32>
    %cst = arith.constant dense<0.000000e+00> : vector<8x96xf32>
    %8 = tpu.matmul %7, %4, %cst {dimension_numbers = #tpu.dot_dimension_numbers<[1], [1], [0], [0], [0, 0, 1, 0], [], []>} : vector<8x32xf32>, vector<96x32xf32>, vector<8x96xf32> -> vector<8x96xf32>
    %9 = vector.extract_strided_slice %8 {offsets = [0, 0], sizes = [8, 48], strides = [1, 1]} : vector<8x96xf32> to vector<8x48xf32>
    %10 = vector.extract_strided_slice %8 {offsets = [0, 48], sizes = [8, 48], strides = [1, 1]} : vector<8x96xf32> to vector<8x48xf32>
    %11 = arith.negf %9 : vector<8x48xf32>
    %12 = math.exp %11 : vector<8x48xf32>
    %cst_8 = arith.constant 1.000000e+00 : f32
    %13 = vector.broadcast %cst_8 : f32 to vector<8x48xf32>
    %14 = arith.addf %13, %12 : vector<8x48xf32>
    %15 = arith.divf %13, %14 : vector<8x48xf32>
    %16 = arith.mulf %9, %15 : vector<8x48xf32>
    %17 = arith.mulf %16, %10 : vector<8x48xf32>
    %c0_9 = arith.constant 0 : index
    %c0_10 = arith.constant 0 : index
    %18 = vector.load %arg7[%c0_9, %c0_10] : memref<8x32xf32, #tpu.memory_space<vmem>>, vector<8x32xf32>
    %cst_11 = arith.constant dense<0.000000e+00> : vector<8x32xf32>
    %19 = tpu.matmul %17, %6, %cst_11 {dimension_numbers = #tpu.dot_dimension_numbers<[1], [0], [0], [1], [0, 0, 1, 1], [], []>} : vector<8x48xf32>, vector<48x32xf32>, vector<8x32xf32> -> vector<8x32xf32>
    %20 = arith.addf %18, %19 : vector<8x32xf32>
    %c0_12 = arith.constant 0 : index
    %c0_13 = arith.constant 0 : index
    %21 = vector.load %arg7[%c0_12, %c0_13] : memref<8x32xf32, #tpu.memory_space<vmem>>, vector<8x32xf32>
    tpu.vector_store %arg7[%c0_12, %c0_13], %20 {strides = array<i32>} : memref<8x32xf32, #tpu.memory_space<vmem>>, vector<8x32xf32>,
    %c1_i32 = arith.constant 1 : i32
    %22 = arith.cmpi eq, %arg1, %c1_i32 : i32
    %23 = arith.extui %22 : i1 to i32
    %c0_i32_14 = arith.constant 0 : i32
    %24 = arith.cmpi ne, %23, %c0_i32_14 : i32
    scf.if %24 {
      %c0_15 = arith.constant 0 : index
      %c0_16 = arith.constant 0 : index
      %25 = vector.load %arg7[%c0_15, %c0_16] : memref<8x32xf32, #tpu.memory_space<vmem>>, vector<8x32xf32>
      %c0_17 = arith.constant 0 : index
      %c0_18 = arith.constant 0 : index
      %26 = vector.load %arg6[%c0_17, %c0_18] : memref<8x32xf32, #tpu.memory_space<vmem>>, vector<8x32xf32>
      tpu.vector_store %arg6[%c0_17, %c0_18], %25 {strides = array<i32>} : memref<8x32xf32, #tpu.memory_space<vmem>>, vector<8x32xf32>,
    } else {
    }
    return
  }
  func.func @transform_0(%arg0: i32, %arg1: i32, %arg2: memref<6xi32, #tpu.memory_space<smem>>) -> (i32, i32) {
    %c0_i32 = arith.constant 0 : i32
    %c0_i32_0 = arith.constant 0 : i32
    return %arg0, %c0_i32 : i32, i32
  }
  func.func @transform_1(%arg0: i32, %arg1: i32, %arg2: memref<6xi32, #tpu.memory_space<smem>>) -> (i32, i32, i32) {
    %0 = arith.index_cast %arg0 : i32 to index
    %1 = memref.load %arg2[%0] : memref<6xi32, #tpu.memory_space<smem>>
    %c0_i32 = arith.constant 0 : i32
    %c0_i32_0 = arith.constant 0 : i32
    return %1, %arg1, %c0_i32 : i32, i32, i32
  }
  func.func @transform_2(%arg0: i32, %arg1: i32, %arg2: memref<6xi32, #tpu.memory_space<smem>>) -> (i32, i32, i32) {
    %0 = arith.index_cast %arg0 : i32 to index
    %1 = memref.load %arg2[%0] : memref<6xi32, #tpu.memory_space<smem>>
    %c0_i32 = arith.constant 0 : i32
    %c0_i32_0 = arith.constant 0 : i32
    return %1, %arg1, %c0_i32 : i32, i32, i32
  }
  func.func @transform_3(%arg0: i32, %arg1: i32, %arg2: memref<6xi32, #tpu.memory_space<smem>>) -> (i32, i32) {
    %c0_i32 = arith.constant 0 : i32
    %c0_i32_0 = arith.constant 0 : i32
    return %arg0, %c0_i32 : i32, i32
  }
}

</mosaic_0001>

<bundles_post_ra>
// kernel: custom-call
= control target key start
LH: loop header
LB: loop body
LE: loop exit
PB: predicated region body
PF: predicated region fallthrough
CT: control target
= control target key end

     0   :  { %s6_s0 = inlined_call_operand.vmem [shape: u32[6], index: 0, kind: output, shape index: {}]  }

// kernel: conditional_feed_forward.1
= control target key start
LH: loop header
LB: loop body
LE: loop exit
PB: predicated region body
PF: predicated region fallthrough
CT: control target
= control target key end

     0   :  { %s647_s18 = smov [#allocation4]   ;;  %s784_s0 = inlined_call_operand.vmem [shape: s32[6], index: 0, kind: input, shape index: {}]   ;;  %s785_s1 = inlined_call_operand.vmem [shape: f32[48,32], index: 1, kind: input, shape index: {}]   ;;  %s786_s2 = inlined_call_operand.vmem [shape: f32[4,192,32], index: 2, kind: input, shape index: {}]   ;;  %s787_s3 = inlined_call_operand.vmem [shape: f32[4,96,32], index: 3, kind: input, shape index: {}]   ;;  %s788_s4 = inlined_call_operand.vmem [shape: f32[48,32], index: 4, kind: output, shape index: {}]  }
   0x1   :  { %s10_s17 = sshll.u32 %s784_s0, 4  ;;  %s11_s17 = int_to_ptr.vmem [resolvable:$true] %s10_s17 }
   0x2   :  { %13 = dma.vmem_to_smem %s11_s17, 16, %s647_s18, [#allocation3] }
   0x3   :  { %625 = dma.done.wait [#allocation3], 16 }
   0x4   :  { %626 = vsyncadd [#allocation3], 4294967280 }
   0x5   :  { %16 = sfence }
   0x6   :  { %s678_s19 = smov 0   ;;  %s680_s20 = smov 0  }
   0x7   :  { %s682_s21 = smov 0   ;;  %s684_s22 = smov 0  }
   0x8   :  { %s686_s23 = smov 0  }
   0x9 LB: > { %s31_s0 = sadd.s32 1, %s637_s21  ;;  %s34_s24 = sadd.s32 1, %s641_s22  ;;  %s645_s23 = sphi %s686_s23, %s22_s23   ;;  %s641_s22 = sphi %s684_s22, %s792_s22   ;;  %s637_s21 = sphi %s682_s21, %s791_s21   ;;  %s633_s20 = sphi %s680_s20, %s790_s20   ;;  %s629_s19 = sphi %s678_s19, %s789_s19  }
   0xa   : > { %p32_p0 = scmp.ge.s32.totalorder %s31_s0, 2  ;;  %p520_p1 = scmp.ge.s32.totalorder %s645_s23, 1 }
   0xb   : > { %p199_p2 = scmp.lt.s32.totalorder %s645_s23, 13 }
   0xc   : > { %s794_s0 = smov (%p32_p0, %s31_s0), 0  ;;  %s796_s24 = smov (!%p32_p0, %s34_s24), %s641_s22 }
   0xd   : > { %p200_p3 = pnand %p520_p1, %p199_p2  ;;  %p36_p4 = scmp.ge.s32.totalorder %s796_s24, 6 }
   0xe   : > { %p241_p5 = scmp.lt.s32.totalorder (!%p200_p3), %s633_s20, 5  ;;  %s245_s25 = sld [smem:[#allocation4 + %s633_s20]] (!%p200_p3) }
   0xf   : > { %s798_s24 = smov (%p36_p4, %s796_s24), 0  ;;  %203 = sbr.rel (%p200_p3) target bundleno = 462 (0x1ce), region = 32 }
  0x10   : > { %s246_s26 = smul.u32 (!%p200_p3), 12, %s629_s19  ;;  %s257_s27 = sld [smem:[#allocation4 + %s633_s20]] (!%p200_p3) }
  0x11   : > { %s258_s6 = smul.u32 (!%p200_p3), 6, %s629_s19  ;;  %p525_p10 = scmp.ne.s32.totalorder (!%p200_p3), %s629_s19, 0 }
  0x12   : > { %p249_p6 = scmp.lt.s32.totalorder (!%p200_p3), %s246_s26, 23 }
  0x13   : > { %p261_p9 = scmp.lt.s32.totalorder (!%p200_p3), %s258_s6, 11 }
  0x14   : > { %s800_s20 = smov (!%p241_p5, %s633_s20), 5  ;;  %p247_p7 = scmp.lt.s32.totalorder %s245_s25, 3 }
  0x15   : > { %s521_s28 = sshll.u32 %s800_s20, 3  ;;  %s802_s26 = smov (!%p249_p6, %s246_s26), 23 }
  0x16   : > { %s714_s5 = scalar_lea.vmem %s785_s1, %s521_s28  ;;  %s720_s9 = scalar_lea.vmem %s788_s4, %s521_s28 }
  0x17   : > { %s804_s25 = smov (!%p247_p7, %s245_s25), 3  ;;  %p259_p8 = scmp.lt.s32.totalorder %s257_s27, 3 }
  0x18   : > { %s544_s10 = smul.u32 24, %s804_s25  ;;  %s808_s6 = smov (!%p261_p9, %s258_s6), 11 }
  0x19   : > { %s806_s27 = smov (!%p259_p8, %s257_s27), 3 }
  0x1a   : > { %s252_s11 = sadd.s32 %s544_s10, %s802_s26  ;;  %s545_s13 = smul.u32 12, %s806_s27 }
  0x1b   : > { %s522_s12 = sshll.u32 %s252_s11, 3  ;;  %276 = sbr.rel (%p525_p10) target bundleno = 34 (0x22), region = 36 }
  0x1c   : > { %s725_s16 = scalar_lea.vmem %s786_s2, %s522_s12  ;;  %s264_s17 = sadd.s32 %s545_s13, %s808_s6 }
  0x1d   : > { %s523_s18 = sshll.u32 %s264_s17, 3 }
  0x1e   : > { %s730_s29 = scalar_lea.vmem %s787_s3, %s523_s18 }
  0x20   : > { %vm277_vm0 = vcmask 261120   ;;  %v648_v0 = vmov 0.0  }
  0x21   : > { %278 = vst.msk [vmem:[#allocation2] sm:$0xff] %vm277_vm0, %v648_v0 }
  0x22 PF: > { %v290_v1 = vld [vmem:[%s725_s16 + $0x58] sm:$0xff]  ;;  %vm298_vm1 = vcmask 261120   ;;  %v289_v2 = vld [vmem:[%s725_s16 + $0x50] sm:$0xff]  ;;  %v288_v3 = vld [vmem:[%s725_s16 + $0x48] sm:$0xff]  ;;  %s649_s25 = smov 80   ;;  %vm384_vm6 = vcmask 392192  }
  0x23   : > { %526 = vmatpush.xpose.msk.msra.mxu0 %vm298_vm1, %v290_v1  ;;  %v287_v4 = vld [vmem:[%s725_s16 + $0x40] sm:$0xff]  ;;  %v286_v5 = vld [vmem:[%s725_s16 + $0x38] sm:$0xff]  ;;  %v285_v6 = vld [vmem:[%s725_s16 + $0x30] sm:$0xff]  ;;  %p541_p11 = scmp.ne.s32.totalorder %s629_s19, 1 }
  0x24   : > { %v284_v7 = vld [vmem:[%s725_s16 + $0x28] sm:$0xff]  ;;  %v283_v8 = vld [vmem:[%s725_s16 + $0x20] sm:$0xff]  ;;  %v282_v9 = vld [vmem:[%s725_s16 + $0x18] sm:$0xff] }
  0x25   : > { %v281_v10 = vld [vmem:[%s725_s16 + $0x10] sm:$0xff]  ;;  %v280_v11 = vld [vmem:[%s725_s16 + $0x8] sm:$0xff]  ;;  %v279_v12 = vld [vmem:[%s725_s16] sm:$0xff] }
  0x26   : > { %v297_v13 = vld [vmem:[%s714_s5] sm:$0xff]  ;;  %v296_v14 = vld [vmem:[%s730_s29 + $0x28] sm:$0xff]  ;;  %v294_v16 = vld [vmem:[%s730_s29 + $0x18] sm:$0xff] }
  0x27   : > { %527 = vmatpush.xpose.msk.msra.mxu0 %vm298_vm1, %v289_v2  ;;  %v295_v15 = vld [vmem:[%s730_s29 + $0x20] sm:$0xff]  ;;  %398 = vmatpush.msra.mxu1 %v296_v14  ;;  %v293_v18 = vld [vmem:[%s730_s29 + $0x10] sm:$0xff]  ;;  %v292_v22 = vld [vmem:[%s730_s29 + $0x8] sm:$0xff] }
  0x28   : > { %v291_v23 = vld [vmem:[%s730_s29] sm:$0xff] }
  0x29   : > { %399 = vmatpush.msra.mxu1 %v295_v15  ;;  %v383_v37 = vld [vmem:[#allocation2] sm:$0xff] }
  0x2b   : > { %528 = vmatpush.xpose.msk.msra.mxu0 %vm298_vm1, %v288_v3  ;;  %400 = vmatpush.msra.mxu1 %v294_v16 }
  0x2d   : > { %401 = vmatpush.msra.mxu1 %v293_v18 }
  0x2f   : > { %529 = vmatpush.xpose.msk.msra.mxu0 %vm298_vm1, %v287_v4  ;;  %402 = vmatpush.msra.mxu1 %v292_v22 }
  0x31   : > { %403 = vmatpush.msra.mxu1 %v291_v23 }
  0x33   : > { %530 = vmatpush.xpose.msk.msra.mxu0 %vm298_vm1, %v286_v5 }
  0x37   : > { %531 = vmatpush.xpose.msk.msra.mxu0 %vm298_vm1, %v285_v6 }
  0x3b   : > { %532 = vmatpush.xpose.msk.msra.mxu0 %vm298_vm1, %v284_v7 }
  0x3f   : > { %533 = vmatpush.xpose.msk.msra.mxu0 %vm298_vm1, %v283_v8 }
  0x43   : > { %534 = vmatpush.xpose.msk.msra.mxu0 %vm298_vm1, %v282_v9 }
  0x47   : > { %535 = vmatpush.xpose.msk.msra.mxu0 %vm298_vm1, %v281_v10 }
  0x4b   : > { %536 = vmatpush.xpose.msk.msra.mxu0 %vm298_vm1, %v280_v11 }
  0x4f   : > { %537 = vmatpush.xpose.msk.msra.mxu0 %vm298_vm1, %v279_v12 }
  0x52   : > { %538 = vmatmul.msk.f32.vlgmr.msra.gmra.mxu0 %vm298_vm1, %v297_v13 }
  0xcf   : > { %v355_v17 = vpop.f32.mrf.mxu0 }
  0xd0   : > { %379 = vrot.lane.b32.xlu0 %v355_v17, %s649_s25  ;;  %v539_v19 = vmul.f32 -1.442695, %v355_v17 }
  0xd2   : > { %589 = vpow2.f32 %v539_v19 }
  0xd8   : > { %v590_v20 = vpop.eup %589 }
  0xd9   : > { %v361_v21 = vadd.f32 1.0, %v590_v20 }
  0xdb   : > { %591 = vrcp.f32 %v361_v21  ;;  %v373_v29 = vand.u32 2147483648, %v361_v21  ;;  %vm367_vm3 = vweird.f32 %v361_v21  ;;  %v371_v30 = vand.u32 2147483647, %v361_v21 }
  0xdd   : > { %v374_v32 = vor.u32 1.1754944e-38, %v373_v29  ;;  %vm372_vm5 = vcmp.eq.f32.partialorder %v371_v30, 8.507059e+37 }
  0xe1   : > { %v592_v24 = vpop.eup %591 }
  0xe2   : > { %v363_v25 = vmul.f32 %v592_v24, %v361_v21  ;;  %vm368_vm2 = vweird.f32 %v592_v24 }
  0xe3   : > { %vm369_vm4 = vmor %vm367_vm3, %vm368_vm2 }
  0xe4   : > { %v364_v26 = vsub.f32 1.0, %v363_v25 }
  0xe6   : > { %v365_v27 = vmul.f32 %v592_v24, %v364_v26 }
  0xe8   : > { %v366_v28 = vadd.f32 %v592_v24, %v365_v27 }
  0xea   : > { %v370_v31 = vsel %vm369_vm4, %v592_v24, %v366_v28 }
  0xeb   : > { %v375_v33 = vsel %vm372_vm5, %v374_v32, %v370_v31 }
  0xec   : > { %v377_v34 = vmul.f32 %v375_v33, %v355_v17 }
 0x142   : > { %v380_v35 = vpop.permute.xlu0 %379 }
 0x143   : > { %v382_v36 = vmul.f32 %v380_v35, %v377_v34 }
 0x145   : > { %540 = vmatmul.msk.f32.vlgmr.msra.gmra.mxu1 %vm384_vm6, %v382_v36 }
 0x1c1   : > { %413 = sbr.rel (%p541_p11) target bundleno = 462 (0x1ce), region = 40 }
 0x1c2   : > { %v405_v38 = vpop.f32.mrf.mxu1 }
 0x1c3   : > { %v408_v39 = vadd.f32 %v405_v38, %v383_v37 }
 0x1c5   : > { %409 = vst.msk [vmem:[#allocation2] sm:$0xff] %vm298_vm1, %v408_v39 }
 0x1cc   : > { %v414_v40 = vld [vmem:[#allocation2] sm:$0xff] }
 0x1cd   : > { %415 = vst.msk [vmem:[%s720_s9] sm:$0xff] %vm298_vm1, %v414_v40 }
 0x1ce PF: > { %s22_s23 = sadd.s32 1, %s645_s23   ;;  %s789_s19 = smov %s637_s21 }
 0x1cf   : > { %p19_p12 = scmp.ge.s32.totalorder %s22_s23, 14   ;;  %s790_s20 = smov %s641_s22 }
 0x1d0   : > { %s791_s21 = smov %s794_s0  ;;  %s792_s22 = smov %s798_s24 }
 0x1d1   :  { %21 = sbr.rel (!%p19_p12) target bundleno = 9 (0x9), region = 76 }

</bundles_post_ra>
